<compile_context>
chip_gen: v7x
topology: tpu7x:2x2x1
jax: 0.10.0
libtpu: 0.0.40
codegen_flags: <defaults>
</compile_context>

<pallas_src>
import jax
import jax.numpy as jnp
import numpy as np
from jax.experimental import pallas as pl
from jax.experimental.pallas import tpu as pltpu
from math import sqrt


def attention_kernel(k_ref, v_ref, w1k_ref, w1v_ref, b1_ref, w2_ref, o_ref):
    # k_ref:   (TB, d)     batch-tile of K
    # v_ref:   (TB, T, d)  batch-tile of V
    # w1k_ref: (d, H)      K-half of linear1 weight, pre-transposed (in, out)
    # w1v_ref: (d, H)      V-half of linear1 weight, pre-transposed (in, out)
    # b1_ref:  (1, H)
    # w2_ref:  (1, H)      linear2 weight as a lane-dense row (output width 1)
    # o_ref:   (TB, d)
    TB, T, d = v_ref.shape
    H = w1v_ref.shape[1]

    k = k_ref[...]                                   # (TB, d)
    v = v_ref[...]                                   # (TB, T, d)

    # linear1(cat([K, V], -1)) == K @ W1k^T + V @ W1v^T + b1.
    # The K-part is a per-row matvec computed once per batch row and folded in with
    # the bias.
    # TODO(synk): optionally cast matmul operands to bf16 on v6e/v7x (keeping f32
    # accumulation) for MXU peak throughput; kept f32 here for accuracy.
    kpart = jnp.dot(k, w1k_ref[...],
                    preferred_element_type=jnp.float32) + b1_ref[...]        # (TB, H)
    vpart = jnp.dot(v.reshape(TB * T, d), w1v_ref[...],
                    preferred_element_type=jnp.float32)                      # (TB*T, H)

    fc1 = jnp.maximum(vpart.reshape(TB, T, H) + kpart[:, None, :], 0.0)      # (TB, T, H)

    # linear2 has output width 1 -> VPU multiply + lane reduction, giving the scores
    # as a lane-dense (TB, T) slab. linear2's bias is a constant shift of every score
    # and therefore a no-op under softmax, so it is omitted.
    score = jnp.sum(fc1 * w2_ref[...], axis=-1)                              # (TB, T)

    # TODO(synk): optional `mask` argument (masked_fill with -2**32+1) not wired in.

    # alpha = softmax(score, dim=1)  (hist_len axis). Exact normalization: the EUP
    # approximate reciprocal was the accuracy bottleneck and the divide is negligible
    # compared to the GEMMs.
    m = jnp.max(score, axis=-1, keepdims=True)                               # (TB, 1)
    e = jnp.exp(score - m)                                                   # (TB, T)
    alpha = e / jnp.sum(e, axis=-1, keepdims=True)                           # (TB, T)

    # TODO(synk): training-mode Dropout(p=0.5) on alpha not implemented (eval mode).

    # att = (alpha * V).sum(dim=1)
    att = jnp.sum(alpha[:, :, None] * v, axis=1)                             # (TB, d)
    o_ref[...] = att.astype(o_ref.dtype)


def _choose_batch_tile(B, T, d, itemsize=4, target_rows=256, vmem_budget=8 << 20):
    """Rows per grid step: make the fc1 GEMM M-dim (TB*T) MXU-sized (~256 rows),
    keep the double-buffered V tile within a VMEM budget, and keep TB a multiple
    of 8 (sublane alignment)."""
    b_pad8 = -(-B // 8) * 8
    tb = -(-target_rows // T)                   # ceil(target_rows / T)
    tb = -(-tb // 8) * 8                        # round up to multiple of 8
    max_tb = max(8, (vmem_budget // (2 * T * d * itemsize)) // 8 * 8)
    return max(8, min(tb, max_tb, b_pad8))


def attention_forward(K, V, w1, b1, w2, b2):
    """K: (B, d), V: (B, T, d). Weights follow PyTorch Linear convention:
    w1: (H, 2d), b1: (H,), w2: (1, H), b2: (1,). Returns (B, d)."""
    B, d = K.shape
    _, T, _ = V.shape
    H = w1.shape[0]

    # Split linear1's weight into K-half / V-half, pre-transposed to (in, out);
    # this eliminates the fused (T, 2d) concat inside the kernel.
    w1k_t = jnp.transpose(w1[:, :d])            # (d, H)
    w1v_t = jnp.transpose(w1[:, d:])            # (d, H)
    b1r = b1.reshape(1, H)
    w2r = w2.reshape(1, H)
    del b2  # softmax is invariant to the constant linear2 bias.

    TB = _choose_batch_tile(B, T, d, itemsize=jnp.dtype(V.dtype).itemsize)
    B_pad = -(-B // TB) * TB
    if B_pad != B:
        # Zero-pad the batch to a whole number of tiles; padded rows are sliced off.
        K = jnp.pad(K, ((0, B_pad - B), (0, 0)))
        V = jnp.pad(V, ((0, B_pad - B), (0, 0), (0, 0)))

    grid_spec = pltpu.PrefetchScalarGridSpec(
        num_scalar_prefetch=0,
        grid=(B_pad // TB,),
        in_specs=[
            pl.BlockSpec((TB, d), lambda b: (b, 0)),
            pl.BlockSpec((TB, T, d), lambda b: (b, 0, 0)),
            pl.BlockSpec((d, H), lambda b: (0, 0)),     # weights stay resident:
            pl.BlockSpec((d, H), lambda b: (0, 0)),     # constant block index
            pl.BlockSpec((1, H), lambda b: (0, 0)),
            pl.BlockSpec((1, H), lambda b: (0, 0)),
        ],
        out_specs=pl.BlockSpec((TB, d), lambda b: (b, 0)),
    )

    out = pl.pallas_call(
        attention_kernel,
        out_shape=jax.ShapeDtypeStruct((B_pad, d), V.dtype),
        grid_spec=grid_spec,
        compiler_params=pltpu.CompilerParams(
            dimension_semantics=("parallel",)),
    )(K, V, w1k_t, w1v_t, b1r, w2r)

    return out[:B] if B_pad != B else out


def reference_forward_np(K, V, w1, b1, w2, b2):
    """Exact float64 NumPy reference of the PyTorch forward (eval mode)."""
    K = np.asarray(K, dtype=np.float64)
    V = np.asarray(V, dtype=np.float64)
    w1 = np.asarray(w1, dtype=np.float64)
    b1 = np.asarray(b1, dtype=np.float64)
    w2 = np.asarray(w2, dtype=np.float64)
    b2 = np.asarray(b2, dtype=np.float64)
    B, T, d = V.shape
    K_exp = np.broadcast_to(K[:, None, :], (B, T, d))
    fusion = np.concatenate([K_exp, V], axis=-1)                 # (B, T, 2d)
    fc1 = np.maximum(fusion @ w1.T + b1, 0.0)                    # (B, T, H)
    score = fc1 @ w2.T + b2                                      # (B, T, 1)
    score = score - score.max(axis=1, keepdims=True)
    e = np.exp(score)
    alpha = e / e.sum(axis=1, keepdims=True)
    return (alpha * V).sum(axis=1)                               # (B, d)


if __name__ == "__main__":
    # Small shapes consistent with the module: batch=2, hist_len=8, d=16, hidden=32.
    B, T, d, H = 2, 8, 16, 32
    in_features = d
    hidden_size = H

    key = jax.random.PRNGKey(0)
    k_K, k_V, k_w1, k_b1, k_w2, k_b2 = jax.random.split(key, 6)

    K = jax.random.normal(k_K, (B, d), dtype=jnp.float32)
    V = jax.random.normal(k_V, (B, T, d), dtype=jnp.float32)

    # Deterministic parameter init mirroring the module's __init__:
    # xavier_normal_ on weights (std = sqrt(2/(fan_in+fan_out))),
    # PyTorch-default uniform(-1/sqrt(fan_in), 1/sqrt(fan_in)) on biases.
    fan_in1, fan_out1 = 2 * in_features, hidden_size
    w1 = jax.random.normal(k_w1, (hidden_size, 2 * in_features),
                           dtype=jnp.float32) * sqrt(2.0 / (fan_in1 + fan_out1))
    b1 = jax.random.uniform(k_b1, (hidden_size,), dtype=jnp.float32,
                            minval=-1.0 / sqrt(fan_in1), maxval=1.0 / sqrt(fan_in1))

    fan_in2, fan_out2 = hidden_size, 1
    w2 = jax.random.normal(k_w2, (1, hidden_size),
                           dtype=jnp.float32) * sqrt(2.0 / (fan_in2 + fan_out2))
    b2 = jax.random.uniform(k_b2, (1,), dtype=jnp.float32,
                            minval=-1.0 / sqrt(fan_in2), maxval=1.0 / sqrt(fan_in2))

    out = attention_forward(K, V, w1, b1, w2, b2)
    out = jax.block_until_ready(out)

    ref = reference_forward_np(K, V, w1, b1, w2, b2)
    assert out.shape == (B, d)
    # The in-kernel GEMMs run at the MXU's default f32 precision (bf16 passes with
    # f32 accumulation on some TPU generations), so budget ~1e-2 against the exact
    # float64 reference; a structural bug would be orders of magnitude larger.
    assert np.allclose(np.asarray(out, dtype=np.float64), ref,
                       atol=1e-2, rtol=1e-2), "mismatch vs reference"

    print("KERNEL_OK")
</pallas_src>

<mosaic_0001>
module attributes {stable_mosaic.version = 11 : i64} {
  func.func @attention_kernel(%arg0: i32, %arg1: memref<8x16xf32, #tpu.memory_space<vmem>>, %arg2: memref<8x8x16xf32, #tpu.memory_space<vmem>>, %arg3: memref<16x32xf32, #tpu.memory_space<vmem>>, %arg4: memref<16x32xf32, #tpu.memory_space<vmem>>, %arg5: memref<1x32xf32, #tpu.memory_space<vmem>>, %arg6: memref<1x32xf32, #tpu.memory_space<vmem>>, %arg7: memref<8x16xf32, #tpu.memory_space<vmem>>) attributes {dimension_semantics = [#tpu.dimension_semantics<parallel>], iteration_bounds = array<i64: 1>, scalar_prefetch = 0 : i64, scratch_operands = 0 : i64, tpu.core_type = #tpu.core_type<tc>, window_params = [{transform_indices = @transform_0, window_bounds = array<i64: 8, 16>}, {transform_indices = @transform_1, window_bounds = array<i64: 8, 8, 16>}, {pipeline_mode = #tpu.pipeline_mode<synchronous>, transform_indices = @transform_2, window_bounds = array<i64: 16, 32>}, {pipeline_mode = #tpu.pipeline_mode<synchronous>, transform_indices = @transform_3, window_bounds = array<i64: 16, 32>}, {pipeline_mode = #tpu.pipeline_mode<synchronous>, transform_indices = @transform_4, window_bounds = array<i64: 1, 32>}, {pipeline_mode = #tpu.pipeline_mode<synchronous>, transform_indices = @transform_5, window_bounds = array<i64: 1, 32>}, {transform_indices = @transform_6, window_bounds = array<i64: 8, 16>}]} {
    %c0 = arith.constant 0 : index
    %c0_0 = arith.constant 0 : index
    %0 = vector.load %arg1[%c0, %c0_0] : memref<8x16xf32, #tpu.memory_space<vmem>>, vector<8x16xf32>
    %c0_1 = arith.constant 0 : index
    %c0_2 = arith.constant 0 : index
    %c0_3 = arith.constant 0 : index
    %1 = vector.load %arg2[%c0_1, %c0_2, %c0_3] : memref<8x8x16xf32, #tpu.memory_space<vmem>>, vector<8x8x16xf32>
    %c0_4 = arith.constant 0 : index
    %c0_5 = arith.constant 0 : index
    %2 = vector.load %arg3[%c0_4, %c0_5] : memref<16x32xf32, #tpu.memory_space<vmem>>, vector<16x32xf32>
    %cst = arith.constant dense<0.000000e+00> : vector<8x32xf32>
    %3 = tpu.matmul %0, %2, %cst {dimension_numbers = #tpu.dot_dimension_numbers<[1], [0], [0], [1], [0, 0, 1, 1], [], []>} : vector<8x16xf32>, vector<16x32xf32>, vector<8x32xf32> -> vector<8x32xf32>
    %c0_6 = arith.constant 0 : index
    %c0_7 = arith.constant 0 : index
    %4 = vector.load %arg5[%c0_6, %c0_7] : memref<1x32xf32, #tpu.memory_space<vmem>>, vector<1x32xf32>
    %5 = vector.broadcast %4 : vector<1x32xf32> to vector<8x32xf32>
    %6 = arith.addf %3, %5 : vector<8x32xf32>
    %7 = vector.shape_cast %1 : vector<8x8x16xf32> to vector<64x16xf32>
    %c0_8 = arith.constant 0 : index
    %c0_9 = arith.constant 0 : index
    %8 = vector.load %arg4[%c0_8, %c0_9] : memref<16x32xf32, #tpu.memory_space<vmem>>, vector<16x32xf32>
    %cst_10 = arith.constant dense<0.000000e+00> : vector<64x32xf32>
    %9 = tpu.matmul %7, %8, %cst_10 {dimension_numbers = #tpu.dot_dimension_numbers<[1], [0], [0], [1], [0, 0, 1, 1], [], []>} : vector<64x16xf32>, vector<16x32xf32>, vector<64x32xf32> -> vector<64x32xf32>
    %10 = vector.shape_cast %9 : vector<64x32xf32> to vector<8x8x32xf32>
    %11 = vector.shape_cast %6 : vector<8x32xf32> to vector<8x1x32xf32>
    %12 = vector.broadcast %11 : vector<8x1x32xf32> to vector<8x8x32xf32>
    %13 = arith.addf %10, %12 : vector<8x8x32xf32>
    %cst_11 = arith.constant 0.000000e+00 : f32
    %14 = vector.broadcast %cst_11 : f32 to vector<8x8x32xf32>
    %15 = arith.maximumf %13, %14 : vector<8x8x32xf32>
    %c0_12 = arith.constant 0 : index
    %c0_13 = arith.constant 0 : index
    %16 = vector.load %arg6[%c0_12, %c0_13] : memref<1x32xf32, #tpu.memory_space<vmem>>, vector<1x32xf32>
    %17 = vector.shape_cast %16 : vector<1x32xf32> to vector<1x1x32xf32>
    %18 = vector.broadcast %17 : vector<1x1x32xf32> to vector<8x8x32xf32>
    %19 = arith.mulf %15, %18 : vector<8x8x32xf32>
    %cst_14 = arith.constant dense<0.000000e+00> : vector<8x8xf32>
    %20 = vector.multi_reduction <add>, %19, %cst_14 [2] : vector<8x8x32xf32> to vector<8x8xf32>
    %cst_15 = arith.constant dense<0xFF800000> : vector<8xf32>
    %21 = vector.multi_reduction <maximumf>, %20, %cst_15 [1] : vector<8x8xf32> to vector<8xf32>
    %22 = vector.shape_cast %21 : vector<8xf32> to vector<8x1xf32>
    %23 = vector.broadcast %22 : vector<8x1xf32> to vector<8x8xf32>
    %24 = arith.subf %20, %23 : vector<8x8xf32>
    %25 = math.exp %24 : vector<8x8xf32>
    %cst_16 = arith.constant dense<0.000000e+00> : vector<8xf32>
    %26 = vector.multi_reduction <add>, %25, %cst_16 [1] : vector<8x8xf32> to vector<8xf32>
    %27 = vector.shape_cast %26 : vector<8xf32> to vector<8x1xf32>
    %28 = vector.broadcast %27 : vector<8x1xf32> to vector<8x8xf32>
    %29 = arith.divf %25, %28 : vector<8x8xf32>
    %30 = vector.shape_cast %29 : vector<8x8xf32> to vector<8x8x1xf32>
    %31 = vector.broadcast %30 : vector<8x8x1xf32> to vector<8x8x16xf32>
    %32 = arith.mulf %31, %1 : vector<8x8x16xf32>
    %cst_17 = arith.constant dense<0.000000e+00> : vector<8x16xf32>
    %33 = vector.multi_reduction <add>, %32, %cst_17 [1] : vector<8x8x16xf32> to vector<8x16xf32>
    %c0_18 = arith.constant 0 : index
    %c0_19 = arith.constant 0 : index
    %34 = vector.load %arg7[%c0_18, %c0_19] : memref<8x16xf32, #tpu.memory_space<vmem>>, vector<8x16xf32>
    tpu.vector_store %arg7[%c0_18, %c0_19], %33 {strides = array<i32>} : memref<8x16xf32, #tpu.memory_space<vmem>>, vector<8x16xf32>,
    return
  }
  func.func @transform_0(%arg0: i32) -> (i32, i32) {
    %c0_i32 = arith.constant 0 : i32
    %c0_i32_0 = arith.constant 0 : i32
    return %arg0, %c0_i32 : i32, i32
  }
  func.func @transform_1(%arg0: i32) -> (i32, i32, i32) {
    %c0_i32 = arith.constant 0 : i32
    %c0_i32_0 = arith.constant 0 : i32
    %c0_i32_1 = arith.constant 0 : i32
    return %arg0, %c0_i32, %c0_i32_0 : i32, i32, i32
  }
  func.func @transform_2(%arg0: i32) -> (i32, i32) {
    %c0_i32 = arith.constant 0 : i32
    %c0_i32_0 = arith.constant 0 : i32
    %c0_i32_1 = arith.constant 0 : i32
    return %c0_i32, %c0_i32_0 : i32, i32
  }
  func.func @transform_3(%arg0: i32) -> (i32, i32) {
    %c0_i32 = arith.constant 0 : i32
    %c0_i32_0 = arith.constant 0 : i32
    %c0_i32_1 = arith.constant 0 : i32
    return %c0_i32, %c0_i32_0 : i32, i32
  }
  func.func @transform_4(%arg0: i32) -> (i32, i32) {
    %c0_i32 = arith.constant 0 : i32
    %c0_i32_0 = arith.constant 0 : i32
    %c0_i32_1 = arith.constant 0 : i32
    return %c0_i32, %c0_i32_0 : i32, i32
  }
  func.func @transform_5(%arg0: i32) -> (i32, i32) {
    %c0_i32 = arith.constant 0 : i32
    %c0_i32_0 = arith.constant 0 : i32
    %c0_i32_1 = arith.constant 0 : i32
    return %c0_i32, %c0_i32_0 : i32, i32
  }
  func.func @transform_6(%arg0: i32) -> (i32, i32) {
    %c0_i32 = arith.constant 0 : i32
    %c0_i32_0 = arith.constant 0 : i32
    return %arg0, %c0_i32 : i32, i32
  }
}

</mosaic_0001>

<bundles_post_ra>
// kernel: tpu_custom_call.1
= control target key start
LH: loop header
LB: loop body
LE: loop exit
PB: predicated region body
PF: predicated region fallthrough
CT: control target
= control target key end

     0   :  { %11 = vsyncpa [#allocation3], 0  ;;  %s1365_s0 = inlined_call_operand.hbm [shape: f32[8,16], index: 0, kind: input, shape index: {}]   ;;  %s1366_s1 = inlined_call_operand.hbm [shape: f32[8,8,16], index: 1, kind: input, shape index: {}]   ;;  %s1367_s2 = inlined_call_operand.hbm [shape: f32[16,32], index: 2, kind: input, shape index: {}]   ;;  %s1368_s3 = inlined_call_operand.hbm [shape: f32[16,32], index: 3, kind: input, shape index: {}]   ;;  %s1369_s4 = inlined_call_operand.vmem [shape: f32[1,32], index: 4, kind: input, shape index: {}]   ;;  %s1370_s5 = inlined_call_operand.vmem [shape: f32[1,32], index: 5, kind: input, shape index: {}]   ;;  %s1371_s6 = inlined_call_operand.hbm [shape: f32[8,16], index: 6, kind: output, shape index: {}]  }
   0x1   :  { %12 = vsyncpa [#allocation6], 0 }
   0x2   :  { %13 = vsyncpa [#allocation9], 0 }
   0x3   :  { %14 = vsyncpa [#allocation4], 0  ;;  %s1062_s21 = smov [#allocation5]   ;;  %s944_s25 = scalar_lea.hbm %s1366_s1, 1024 }
   0x4   :  { %s30_s22 = sshll.u32 %s1062_s21, 4  ;;  %p945_p0 = scmp.ne.s32.totalorder %s1366_s1, %s944_s25  ;;  %s31_s22 = int_to_ptr.vmem [resolvable:$true] %s30_s22 }
   0x5   :  { %p948_p1 = scmp.lt.u32.totalorder %s944_s25, %s1366_s1 }
   0x7   :  { %p950_p2 = pnand %p948_p1, %p945_p0 }
   0x9   :  { %953 = shalt.err (!%p950_p2)
}
   0xa   :  { %s954_s30 = scalar_lea.vmem %s31_s22, 1024  ;;  %p959_p4 = scmp.lt.s32.totalorder %s31_s22, %s31_s22 }
   0xb   :  { %p955_p3 = scmp.ne.s32.totalorder %s31_s22, %s954_s30  ;;  %p960_p5 = scmp.lt.s32.totalorder %s954_s30, %s954_s30 }
   0xd   :  { %p961_p6 = por %p960_p5, %p959_p4 }
   0xf   :  { %p962_p7 = pnand %p961_p6, %p955_p3 }
  0x11   :  { %965 = shalt.err (!%p962_p7)
}
  0x12   :  { %s1063_s7 = smov 128   ;;  %s1064_s8 = smov 8  }
  0x13   :  { %36 = dma.hbm_to_vmem [thread:$0]  %s1366_s1, 1024, %s31_s22, [#allocation6], %s1063_s7, %s1063_s7, %s1064_s8  }
  0x14   :  { %s1065_s11 = smov [#allocation2]   ;;  %s1066_s13 = smov [#allocation7]  }
  0x15   :  { %s21_s12 = sshll.u32 %s1065_s11, 4  ;;  %s42_s14 = sshll.u32 %s1066_s13, 4  ;;  %s22_s12 = int_to_ptr.vmem [resolvable:$true] %s21_s12  ;;  %s43_s14 = int_to_ptr.vmem [resolvable:$true] %s42_s14 }
  0x16   :  { %s966_s17 = scalar_lea.hbm %s1365_s0, 128 }
  0x17   :  { %p967_p8 = scmp.ne.s32.totalorder %s1365_s0, %s966_s17  ;;  %p970_p9 = scmp.lt.u32.totalorder %s966_s17, %s1365_s0 }
  0x19   :  { %p972_p10 = pnand %p970_p9, %p967_p8 }
  0x1b   :  { %975 = shalt.err (!%p972_p10)
}
  0x1c   :  { %s976_s1 = scalar_lea.vmem %s22_s12, 128  ;;  %p981_p12 = scmp.lt.s32.totalorder %s22_s12, %s22_s12 }
  0x1d   :  { %p977_p11 = scmp.ne.s32.totalorder %s22_s12, %s976_s1  ;;  %p982_p13 = scmp.lt.s32.totalorder %s976_s1, %s976_s1 }
  0x1f   :  { %p983_p0 = por %p982_p13, %p981_p12 }
  0x21   :  { %p984_p1 = pnand %p983_p0, %p977_p11 }
  0x23   :  { %987 = shalt.err (!%p984_p1)
}
  0x24   :  { %24 = dma.hbm_to_vmem [thread:$0]  %s1365_s0, 128, %s22_s12, [#allocation3]  }
  0x25   :  { %s988_s26 = scalar_lea.hbm %s1367_s2, 256 }
  0x26   :  { %p989_p2 = scmp.ne.s32.totalorder %s1367_s2, %s988_s26  ;;  %p992_p3 = scmp.lt.u32.totalorder %s988_s26, %s1367_s2 }
  0x28   :  { %p994_p4 = pnand %p992_p3, %p989_p2 }
  0x2a   :  { %997 = shalt.err (!%p994_p4)
}
  0x2b   :  { %s998_s9 = scalar_lea.vmem %s43_s14, 256  ;;  %p1003_p6 = scmp.lt.s32.totalorder %s43_s14, %s43_s14 }
  0x2c   :  { %p999_p5 = scmp.ne.s32.totalorder %s43_s14, %s998_s9  ;;  %p1004_p7 = scmp.lt.s32.totalorder %s998_s9, %s998_s9 }
  0x2e   :  { %p1005_p8 = por %p1004_p7, %p1003_p6 }
  0x30   :  { %p1006_p9 = pnand %p1005_p8, %p999_p5 }
  0x32   :  { %1009 = shalt.err (!%p1006_p9)
}
  0x33   :  { %48 = dma.hbm_to_vmem [thread:$0]  %s1367_s2, 256, %s43_s14, [#allocation6], %s1063_s7, %s1063_s7, %s1064_s8  }
  0x34   :  { %s1067_s11 = smov [#allocation8]   ;;  %s1010_s16 = scalar_lea.hbm %s1368_s3, 256 }
  0x35   :  { %s54_s12 = sshll.u32 %s1067_s11, 4  ;;  %p1011_p10 = scmp.ne.s32.totalorder %s1368_s3, %s1010_s16  ;;  %s55_s12 = int_to_ptr.vmem [resolvable:$true] %s54_s12 }
  0x36   :  { %p1014_p11 = scmp.lt.u32.totalorder %s1010_s16, %s1368_s3 }
  0x38   :  { %p1016_p12 = pnand %p1014_p11, %p1011_p10 }
  0x3a   :  { %1019 = shalt.err (!%p1016_p12)
}
  0x3b   :  { %s1020_s21 = scalar_lea.vmem %s55_s12, 256  ;;  %p1025_p0 = scmp.lt.s32.totalorder %s55_s12, %s55_s12 }
  0x3c   :  { %p1021_p13 = scmp.ne.s32.totalorder %s55_s12, %s1020_s21  ;;  %p1026_p1 = scmp.lt.s32.totalorder %s1020_s21, %s1020_s21 }
  0x3e   :  { %p1027_p2 = por %p1026_p1, %p1025_p0 }
  0x40   :  { %p1028_p3 = pnand %p1027_p2, %p1021_p13 }
  0x42   :  { %1031 = shalt.err (!%p1028_p3)
}
  0x43   :  { %60 = dma.hbm_to_vmem [thread:$0]  %s1368_s3, 256, %s55_s12, [#allocation9], %s1063_s7, %s1063_s7, %s1064_s8  }
  0x44   :  { %1054 = dma.done.wait [#allocation3], 128  }
  0x45   :  { %1055 = vsyncadd [#allocation3], 4294967168 }
  0x46   :  { %1056 = dma.done.wait [#allocation6], 1280  }
  0x47   :  { %1057 = vsyncadd [#allocation6], 4294966016 }
  0x48   :  { %1058 = dma.done.wait [#allocation9], 256  }
  0x49   :  { %1059 = vsyncadd [#allocation9], 4294967040  ;;  %v1068_v0 = vmov 0.0|0.0   ;;  %vm1069_vm0 = vmmov 0   ;;  %v1070_v1 = vmov 0.0   ;;  %v86_v2 = vld [vmem:[#allocation7] sm:$0xff]  ;;  %v305_v19 = vlaneseq }
  0x4a   :  { %889 = vmatprep.subr.bf16.mxu0 %v1068_v0  ;;  %870 = vmatprep.mubr.msk.f32.mxu0 %vm1069_vm0, %v1070_v1  ;;  %v87_v3 = vld [vmem:[#allocation7 + $0x8] sm:$0xff]  ;;  %v169_v4 = vld [vmem:[#allocation8] sm:$0xff]  ;;  %v170_v6 = vld [vmem:[#allocation8 + $0x8] sm:$0xff]  ;;  %vm95_vm1 = vcmask 130048   ;;  %v1071_v17 = vmov 1966171168  }
  0x4b   :  { %v890_v5 = vpack.c.bf16 %v87_v3, %v86_v2  ;;  %v1166_v7 = vld [vmem:[#allocation5 + $0x10] sm:$0xff]  ;;  %v892_v8 = vpack.c.bf16 %v170_v6, %v169_v4  ;;  %v77_v9 = vld [vmem:[#allocation2] sm:$0xff]  ;;  %v1170_v10 = vld [vmem:[#allocation5] sm:$0xff]  ;;  %v303_v18 = vunpack.c.l.s4 %v1071_v17  ;;  %v1200_v21 = vshrl.u32 %v305_v19, 7 }
  0x4c   :  { %880 = vmatprep.mubr.msk.f32.mxu1 %vm95_vm1, %v1166_v7  ;;  %v1172_v11 = vld [vmem:[#allocation5 + $0x18] sm:$0xff]  ;;  %v1175_v12 = vld [vmem:[#allocation5 + $0x20] sm:$0xff]  ;;  %v1179_v13 = vld [vmem:[#allocation5 + $0x8] sm:$0xff]  ;;  %vm421_vm2 = vcmask 261120   ;;  %vm488_vm3 = vcmask 1041409   ;;  %vm490_vm4 = vcmask 1042434  }
  0x4d   :  { %891 = vmatpush3.bf16.msra.mxu0 %v890_v5  ;;  %896 = vmatprep.subr.bf16.mxu1 %v892_v8  ;;  %v1185_v14 = vld [vmem:[#allocation5 + $0x28] sm:$0xff]  ;;  %v1189_v15 = vld [vmem:[#allocation5 + $0x30] sm:$0xff]  ;;  %v1195_v16 = vld [vmem:[#allocation5 + $0x38] sm:$0xff]  ;;  %v304_v20 = vunpack.c.0.s8 %v303_v18  ;;  %v1207_v30 = vsub.s32 0, %v1200_v21  ;;  %vm492_vm5 = vcmask 1043459   ;;  %vm494_vm6 = vcmask 1044484  }
  0x4e   :  { %893 = vmatprep.subr.bf16.mxu0 %v892_v8  ;;  %897 = vmatpush3.bf16.msra.mxu1 %v892_v8  ;;  %v842_v22 = vld [vmem:[%s1369_s4] ss:$0 sm:$0xff]  ;;  %vm496_vm7 = vcmask 1045509   ;;  %vm498_vm8 = vcmask 1046534   ;;  %vm500_vm9 = vcmask 1047559   ;;  %vm503_vm10 = vcmask 64512  }
  0x4f   :  { %v307_v23 = vsub.s32 %v304_v20, %v1200_v21  ;;  %v852_v52 = vld [vmem:[%s1370_s5] ss:$0 sm:$0xff]  ;;  %s1073_s5 = smov [#allocation10]  }
  0x50   :  { %871 = vmatmul.mubr.msk.f32.vlgmr.msra.gmra.mrb[0].mxu0 %vm95_vm1, %v77_v9  ;;  %s831_s1 = sshll.u32 %s1073_s5, 4  ;;  %s832_s1 = int_to_ptr.vmem [resolvable:$true] %s831_s1 }
  0x51   :  { %895 = vmatpush3.bf16.msra.mxu0 %v892_v8  ;;  %877 = vmatprep.mubr.msk.f32.mxu0 %vm95_vm1, %v1170_v10  ;;  %s1032_s22 = scalar_lea.vmem %s832_s1, 128  ;;  %p1037_p5 = scmp.lt.s32.totalorder %s832_s1, %s832_s1 }
  0x52   :  { %881 = vmatmul.mubr.msk.f32.vlgmr.msra.gmra.mrb[0].mxu1 %vm95_vm1, %v1172_v11  ;;  %p1033_p4 = scmp.ne.s32.totalorder %s832_s1, %s1032_s22  ;;  %p1038_p6 = scmp.lt.s32.totalorder %s1032_s22, %s1032_s22 }
  0x53   :  { %883 = vmatprep.mubr.msk.f32.mxu1 %vm95_vm1, %v1175_v12 }
  0x54   :  { %878 = vmatmul.mubr.msk.f32.vlgmr.msra.gmra.mrb[2].mxu0 %vm95_vm1, %v1179_v13  ;;  %p1039_p7 = por %p1038_p6, %p1037_p5 }
  0x56   :  { %884 = vmatmul.mubr.msk.f32.gmra.mrb[2].mxu1 %vm95_vm1, %v1185_v14  ;;  %p1040_p8 = pnand %p1039_p7, %p1033_p4 }
  0x57   :  { %886 = vmatprep.mubr.msk.f32.mxu1 %vm95_vm1, %v1189_v15 }
  0x5a   :  { %887 = vmatmul.mubr.msk.f32.gmra.mrb[4].mxu1 %vm95_vm1, %v1195_v16 }
 0x123   :  { %v165_v24 = vpop.f32.mrb[0].mxu0 }
 0x124   :  { %v166_v25 = vadd.f32 %v842_v22, %v165_v24  ;;  %v872_v26 = vpop.f32.mrb[1].mxu0 }
 0x125   :  { %v882_v27 = vpop.f32.mrb[0].mxu1 }
 0x126   :  { %v301_v28 = vcombine.high %v166_v25, %v166_v25  ;;  %v308_v29 = vrot.slane %v166_v25, %v307_v23  ;;  %v271_v31 = vpop.f32.mrb[1].mxu1 }
 0x127   :  { %v879_v32 = vpop.f32.mrb[2].mxu0 }
 0x128   :  { %v315_v33 = vrot.slane %v301_v28, %v307_v23  ;;  %v316_v34 = vcombine.high %v308_v29, %v308_v29  ;;  %v261_v35 = vpop.f32.mrb[3].mxu0  ;;  %v324_v36 = vrot.slane %v308_v29, %v307_v23 }
 0x129   :  { %v885_v37 = vpop.f32.mrb[2].mxu1 }
 0x12a   :  { %v338_v38 = vrot.slane %v316_v34, %v307_v23  ;;  %v353_v39 = vrot.slane %v324_v36, %v1207_v30  ;;  %v346_v40 = vcombine.high %v324_v36, %v324_v36  ;;  %v317_v41 = vcombine.high %v315_v33, %v315_v33  ;;  %v281_v42 = vpop.f32.mrb[3].mxu1 }
 0x12b   :  { %v331_v43 = vrot.slane %v315_v33, %v307_v23 }
 0x12c   :  { %v357_v44 = vrot.slane %v338_v38, %v1207_v30  ;;  %v348_v45 = vcombine.high %v338_v38, %v338_v38  ;;  %v390_v46 = vadd.f32 %v353_v39, %v261_v35  ;;  %v361_v47 = vrot.slane %v346_v40, %v1207_v30 }
 0x12d   :  { %v345_v48 = vrot.slane %v317_v41, %v307_v23  ;;  %v369_v49 = vrot.slane %v331_v43, %v1207_v30  ;;  %v888_v50 = vpop.f32.mrb[4].mxu1  ;;  %v347_v51 = vcombine.high %v331_v43, %v331_v43 }
 0x12e   :  { %v391_v53 = vadd.f32 %v879_v32, %v357_v44  ;;  %v365_v54 = vrot.slane %v348_v45, %v1207_v30  ;;  %v398_v55 = vmax.f32 %v390_v46, 0.0  ;;  %v392_v56 = vadd.f32 %v361_v47, %v271_v31  ;;  %v291_v57 = vpop.f32.mrb[5].mxu1 }
 0x12f   :  { %v373_v58 = vrot.slane %v345_v48, %v1207_v30  ;;  %v394_v59 = vadd.f32 %v369_v49, %v281_v42  ;;  %v349_v60 = vcombine.high %v345_v48, %v345_v48  ;;  %v377_v61 = vrot.slane %v347_v51, %v1207_v30 }
 0x130   :  { %v399_v62 = vmax.f32 %v391_v53, 0.0  ;;  %v393_v63 = vadd.f32 %v882_v27, %v365_v54  ;;  %v400_v0 = vmax.f32 %v392_v56, 0.0  ;;  %v413_v1 = vmul.f32 %v852_v52, %v398_v55 }
 0x131   :  { %v395_v2 = vadd.f32 %v885_v37, %v373_v58  ;;  %v402_v3 = vmax.f32 %v394_v59, 0.0  ;;  %v381_v4 = vrot.slane %v349_v60, %v1207_v30  ;;  %v396_v5 = vadd.f32 %v377_v61, %v291_v57 }
 0x132   :  { %v401_v6 = vmax.f32 %v393_v63, 0.0  ;;  %v422_v8 = vsel %vm421_vm2, %v413_v1, 0.0  ;;  %v415_v9 = vmul.f32 %v852_v52, %v400_v0  ;;  %v414_v17 = vmul.f32 %v852_v52, %v399_v62 }
 0x133   :  { %v397_v18 = vadd.f32 %v888_v50, %v381_v4  ;;  %423 = vadd.xlane.f32.xlu0 %v422_v8  ;;  %v403_v20 = vmax.f32 %v395_v2, 0.0  ;;  %v404_v24 = vmax.f32 %v396_v5, 0.0  ;;  %v417_v26 = vmul.f32 %v852_v52, %v402_v3 }
 0x134   :  { %v428_v22 = vsel %vm421_vm2, %v415_v9, 0.0  ;;  %v416_v23 = vmul.f32 %v852_v52, %v401_v6  ;;  %v425_v25 = vsel %vm421_vm2, %v414_v17, 0.0  ;;  %v455_v37 = vand.u32 127, %v305_v19 }
 0x135   :  { %429 = vadd.xlane.f32.xlu1 %v428_v22  ;;  %v405_v27 = vmax.f32 %v397_v18, 0.0  ;;  %v418_v29 = vmul.f32 %v852_v52, %v403_v20  ;;  %v434_v31 = vsel %vm421_vm2, %v417_v26, 0.0  ;;  %v419_v32 = vmul.f32 %v852_v52, %v404_v24 }
 0x136   :  { %v431_v28 = vsel %vm421_vm2, %v416_v23, 0.0  ;;  %v1230_v39 = vsub.s32 %v455_v37, %v1200_v21  ;;  %v1072_v62 = vmov 0   ;;  %v514_v63 = vsub.s32 1, %v1200_v21 }
 0x137   :  { %426 = vadd.xlane.f32.xlu0 %v425_v25  ;;  %v437_v33 = vsel %vm421_vm2, %v418_v29, 0.0  ;;  %v420_v34 = vmul.f32 %v852_v52, %v405_v27  ;;  %v440_v35 = vsel %vm421_vm2, %v419_v32, 0.0  ;;  %910 = vset.pattern.permute.xlu1 %v1072_v62  ;;  %v518_v0 = vsub.s32 2, %v1200_v21 }
 0x138   :  { %911 = vset.pattern.permute.xlu0 %v1072_v62  ;;  %v522_v1 = vsub.s32 3, %v1200_v21  ;;  %v526_v6 = vsub.s32 4, %v1200_v21  ;;  %v530_v23 = vsub.s32 5, %v1200_v21  ;;  %v534_v27 = vsub.s32 6, %v1200_v21 }
 0x139   :  { %432 = vadd.xlane.f32.xlu1 %v431_v28  ;;  %v443_v36 = vsel %vm421_vm2, %v420_v34, 0.0  ;;  %v538_v32 = vsub.s32 7, %v1200_v21 }
 0x13b   :  { %435 = vadd.xlane.f32.xlu0 %v434_v31 }
 0x13d   :  { %438 = vadd.xlane.f32.xlu1 %v437_v33 }
 0x13f   :  { %441 = vadd.xlane.f32.xlu0 %v440_v35 }
 0x141   :  { %444 = vadd.xlane.f32.xlu1 %v443_v36 }
 0x1c0   :  { %v424_v38 = vpop.xlane.xlu0 %423 }
 0x1c1   :  { %v459_v42 = vrot.slane %v424_v38, %v1230_v39 }
 0x1c2   :  { %v430_v40 = vpop.xlane.xlu1 %429 }
 0x1c3   :  { %v467_v44 = vrot.slane %v430_v40, %v1230_v39 }
 0x1c4   :  { %v427_v41 = vpop.xlane.xlu0 %426 }
 0x1c5   :  { %v463_v43 = vrot.slane %v427_v41, %v1230_v39 }
 0x1c6   :  { %v433_v45 = vpop.xlane.xlu1 %432 }
 0x1c7   :  { %v489_v46 = vsel %vm488_vm3, %v463_v43, %v459_v42  ;;  %v471_v19 = vrot.slane %v433_v45, %v1230_v39 }
 0x1c8   :  { %v491_v47 = vsel %vm490_vm4, %v467_v44, %v489_v46  ;;  %v436_v48 = vpop.xlane.xlu0 %435 }
 0x1c9   :  { %v493_v49 = vsel %vm492_vm5, %v471_v19, %v491_v47  ;;  %v475_v50 = vrot.slane %v436_v48, %v1230_v39 }
 0x1ca   :  { %v439_v51 = vpop.xlane.xlu1 %438 }
 0x1cb   :  { %v495_v52 = vsel %vm494_vm6, %v475_v50, %v493_v49  ;;  %v479_v53 = vrot.slane %v439_v51, %v1230_v39 }
 0x1cc   :  { %v442_v54 = vpop.xlane.xlu0 %441 }
 0x1cd   :  { %v483_v55 = vrot.slane %v442_v54, %v1230_v39  ;;  %v497_v56 = vsel %vm496_vm7, %v479_v53, %v495_v52 }
 0x1ce   :  { %v445_v57 = vpop.xlane.xlu1 %444 }
 0x1cf   :  { %v487_v58 = vrot.slane %v445_v57, %v1230_v39  ;;  %v499_v59 = vsel %vm498_vm8, %v483_v55, %v497_v56 }
 0x1d1   :  { %v501_v60 = vsel %vm500_vm9, %v487_v58, %v499_v59 }
 0x1d2   :  { %v504_v61 = vsel %vm503_vm10, %v501_v60, -inf }
 0x1d3   :  { %505 = vmax.xlane.f32.xlu0 %v504_v61 }
 0x260   :  { %v506_v2 = vpop.xlane.xlu0 %505 }
 0x261   :  { %v511_v3 = vrot.slane %v506_v2, %v1207_v30  ;;  %v515_v4 = vrot.slane %v506_v2, %v514_v63  ;;  %v519_v5 = vrot.slane %v506_v2, %v518_v0  ;;  %v523_v8 = vrot.slane %v506_v2, %v522_v1 }
 0x262   :  { %v527_v24 = vrot.slane %v506_v2, %v526_v6  ;;  %v531_v28 = vrot.slane %v506_v2, %v530_v23  ;;  %v535_v33 = vrot.slane %v506_v2, %v534_v27 }
 0x263   :  { %v548_v9 = vsub.f32 %v424_v38, %v511_v3  ;;  %v549_v17 = vsub.f32 %v427_v41, %v515_v4  ;;  %v550_v18 = vsub.f32 %v430_v40, %v519_v5  ;;  %v551_v25 = vsub.f32 %v433_v45, %v523_v8 }
 0x264   :  { %v552_v29 = vsub.f32 %v436_v48, %v527_v24  ;;  %v553_v34 = vsub.f32 %v439_v51, %v531_v28  ;;  %v539_v38 = vrot.slane %v506_v2, %v538_v32  ;;  %v554_v40 = vsub.f32 %v442_v54, %v535_v33 }
 0x265   :  { %v556_v20 = vmul.f32 1.442695, %v548_v9  ;;  %v558_v22 = vmul.f32 1.442695, %v549_v17  ;;  %v560_v26 = vmul.f32 1.442695, %v550_v18 }
 0x266   :  { %v562_v31 = vmul.f32 1.442695, %v551_v25  ;;  %v564_v35 = vmul.f32 1.442695, %v552_v29  ;;  %v566_v41 = vmul.f32 1.442695, %v553_v34  ;;  %v555_v43 = vsub.f32 %v445_v57, %v539_v38 }
 0x267   :  { %912 = vpow2.f32 %v556_v20  ;;  %v568_v44 = vmul.f32 1.442695, %v554_v40 }
 0x268   :  { %914 = vpow2.f32 %v558_v22  ;;  %v570_v46 = vmul.f32 1.442695, %v555_v43 }
 0x269   :  { %916 = vpow2.f32 %v560_v26 }
 0x26a   :  { %918 = vpow2.f32 %v562_v31 }
 0x26b   :  { %920 = vpow2.f32 %v564_v35 }
 0x26c   :  { %922 = vpow2.f32 %v566_v41 }
 0x26d   :  { %924 = vpow2.f32 %v568_v44 }
 0x26e   :  { %926 = vpow2.f32 %v570_v46 }
 0x271   :  { %v913_v36 = vpop.eup %912 }
 0x272   :  { %v1268_v37 = vpop.eup %914  ;;  %581 = vperm.xlu1 %910, %v913_v36  }
 0x273   :  { %584 = vperm.xlu0 %911, %v1268_v37   ;;  %v1273_v42 = vpop.eup %916 }
 0x274   :  { %v1276_v45 = vpop.eup %918 }
 0x275   :  { %v1279_v19 = vpop.eup %920 }
 0x276   :  { %587 = vperm.xlu1 %910, %v1273_v42   ;;  %v1282_v47 = vpop.eup %922 }
 0x277   :  { %v1285_v48 = vpop.eup %924 }
 0x278   :  { %v1288_v49 = vpop.eup %926 }
 0x27a   :  { %590 = vperm.xlu1 %910, %v1276_v45  }
 0x27e   :  { %593 = vperm.xlu1 %910, %v1279_v19  }
 0x282   :  { %596 = vperm.xlu1 %910, %v1282_v47  }
 0x286   :  { %599 = vperm.xlu1 %910, %v1285_v48  }
 0x28a   :  { %602 = vperm.xlu1 %910, %v1288_v49  }
 0x2f1   :  { %v582_v50 = vpop.permute.xlu1 %581 }
 0x2f2   :  { %v585_v54 = vpop.permute.xlu0 %584  ;;  %v607_v57 = vrot.slane %v582_v50, %v1230_v39 }
 0x2f3   :  { %v611_v56 = vrot.slane %v585_v54, %v1230_v39 }
 0x2f5   :  { %v588_v51 = vpop.permute.xlu1 %587  ;;  %v636_v62 = vsel %vm488_vm3, %v611_v56, %v607_v57 }
 0x2f6   :  { %v615_v58 = vrot.slane %v588_v51, %v1230_v39 }
 0x2f8   :  { %v637_v3 = vsel %vm490_vm4, %v615_v58, %v636_v62 }
 0x2f9   :  { %v591_v52 = vpop.permute.xlu1 %590 }
 0x2fa   :  { %v619_v59 = vrot.slane %v591_v52, %v1230_v39 }
 0x2fc   :  { %v638_v5 = vsel %vm492_vm5, %v619_v59, %v637_v3 }
 0x2fd   :  { %v594_v53 = vpop.permute.xlu1 %593 }
 0x2fe   :  { %v623_v60 = vrot.slane %v594_v53, %v1230_v39 }
 0x300   :  { %v639_v8 = vsel %vm494_vm6, %v623_v60, %v638_v5 }
 0x301   :  { %v597_v55 = vpop.permute.xlu1 %596 }
 0x302   :  { %v627_v2 = vrot.slane %v597_v55, %v1230_v39 }
 0x304   :  { %v640_v17 = vsel %vm496_vm7, %v627_v2, %v639_v8 }
 0x305   :  { %v600_v61 = vpop.permute.xlu1 %599 }
 0x306   :  { %v631_v4 = vrot.slane %v600_v61, %v1230_v39 }
 0x308   :  { %v641_v20 = vsel %vm498_vm8, %v631_v4, %v640_v17 }
 0x309   :  { %v603_v9 = vpop.permute.xlu1 %602 }
 0x30a   :  { %v635_v18 = vrot.slane %v603_v9, %v1230_v39 }
 0x30c   :  { %v642_v22 = vsel %vm500_vm9, %v635_v18, %v641_v20 }
 0x30d   :  { %v644_v24 = vsel %vm503_vm10, %v642_v22, 0.0 }
 0x30e   :  { %645 = vadd.xlane.f32.xlu1 %v644_v24 }
 0x39b   :  { %v646_v25 = vpop.xlane.xlu1 %645 }
 0x39c   :  { %v651_v26 = vrot.slane %v646_v25, %v1207_v30  ;;  %v655_v28 = vrot.slane %v646_v25, %v514_v63  ;;  %v659_v29 = vrot.slane %v646_v25, %v518_v0  ;;  %v663_v39 = vrot.slane %v646_v25, %v522_v1 }
 0x39d   :  { %v667_v33 = vrot.slane %v646_v25, %v526_v6  ;;  %v671_v30 = vrot.slane %v646_v25, %v530_v23  ;;  %v675_v0 = vrot.slane %v646_v25, %v534_v27  ;;  %v679_v6 = vrot.slane %v646_v25, %v538_v32 }
 0x39e   :  { %928 = vrcp.f32 %v651_v26 }
 0x39f   :  { %930 = vrcp.f32 %v655_v28 }
 0x3a0   :  { %932 = vrcp.f32 %v659_v29 }
 0x3a1   :  { %934 = vrcp.f32 %v663_v39 }
 0x3a2   :  { %936 = vrcp.f32 %v667_v33 }
 0x3a3   :  { %938 = vrcp.f32 %v671_v30 }
 0x3a4   :  { %940 = vrcp.f32 %v675_v0 }
 0x3a5   :  { %942 = vrcp.f32 %v679_v6 }
 0x3a8   :  { %v929_v31 = vpop.eup %928 }
 0x3a9   :  { %v689_v34 = vmul.f32 %v929_v31, %v913_v36  ;;  %v931_v35 = vpop.eup %930 }
 0x3aa   :  { %v691_v63 = vmul.f32 %v931_v35, %v1268_v37  ;;  %v933_v38 = vpop.eup %932 }
 0x3ab   :  { %706 = vperm.xlu0 %911, %v689_v34   ;;  %v693_v1 = vmul.f32 %v933_v38, %v1273_v42  ;;  %v935_v40 = vpop.eup %934 }
 0x3ac   :  { %v695_v36 = vmul.f32 %v935_v40, %v1276_v45  ;;  %v937_v41 = vpop.eup %936 }
 0x3ad   :  { %v697_v23 = vmul.f32 %v937_v41, %v1279_v19  ;;  %v939_v37 = vpop.eup %938 }
 0x3ae   :  { %v699_v43 = vmul.f32 %v939_v37, %v1282_v47  ;;  %v941_v27 = vpop.eup %940 }
 0x3af   :  { %711 = vperm.xlu0 %911, %v691_v63   ;;  %v701_v42 = vmul.f32 %v941_v27, %v1285_v48  ;;  %v943_v44 = vpop.eup %942 }
 0x3b0   :  { %v703_v21 = vmul.f32 %v943_v44, %v1288_v49 }
 0x3b3   :  { %716 = vperm.xlu0 %911, %v693_v1  }
 0x3b7   :  { %721 = vperm.xlu0 %911, %v695_v36  }
 0x3bb   :  { %726 = vperm.xlu0 %911, %v697_v23  }
 0x3bf   :  { %731 = vperm.xlu0 %911, %v699_v43  }
 0x3c3   :  { %736 = vperm.xlu0 %911, %v701_v42  }
 0x3c7   :  { %741 = vperm.xlu0 %911, %v703_v21  }
 0x42a   :  { %v707_v32 = vpop.permute.xlu0 %706 }
 0x42b   :  { %v744_v19 = vmul.f32 %v707_v32, %v1170_v10 }
 0x42d   :  { %v752_v48 = vsel %vm95_vm1, %v744_v19, 0.0 }
 0x42e   :  { %v712_v45 = vpop.permute.xlu0 %711  ;;  %v753_v57 = vrot.slane %v752_v48, 4 }
 0x42f   :  { %v745_v46 = vmul.f32 %v712_v45, %v1179_v13 }
 0x430   :  { %v754_v61 = vadd.f32 %v753_v57, %v752_v48 }
 0x431   :  { %v759_v47 = vsel %vm95_vm1, %v745_v46, 0.0 }
 0x432   :  { %v717_v50 = vpop.permute.xlu0 %716  ;;  %v760_v49 = vrot.slane %v759_v47, 4  ;;  %v755_v17 = vrot.slane %v754_v61, 2 }
 0x433   :  { %v746_v51 = vmul.f32 %v717_v50, %v1166_v7 }
 0x434   :  { %v761_v59 = vadd.f32 %v760_v49, %v759_v47  ;;  %v756_v39 = vadd.f32 %v755_v17, %v754_v61 }
 0x435   :  { %v766_v52 = vsel %vm95_vm1, %v746_v51, 0.0 }
 0x436   :  { %v722_v53 = vpop.permute.xlu0 %721  ;;  %v767_v55 = vrot.slane %v766_v52, 4 }
 0x437   :  { %v747_v54 = vmul.f32 %v722_v53, %v1172_v11  ;;  %v762_v11 = vrot.slane %v761_v59, 2 }
 0x438   :  { %v768_v7 = vadd.f32 %v767_v55, %v766_v52 }
 0x439   :  { %v773_v56 = vsel %vm95_vm1, %v747_v54, 0.0  ;;  %v763_v25 = vadd.f32 %v762_v11, %v761_v59 }
 0x43a   :  { %v774_v13 = vrot.slane %v773_v56, 4  ;;  %v727_v58 = vpop.permute.xlu0 %726  ;;  %v769_v8 = vrot.slane %v768_v7, 2 }
 0x43b   :  { %v748_v10 = vmul.f32 %v727_v58, %v1175_v12  ;;  %v764_v63 = vrot.slane %v763_v25, 1 }
 0x43c   :  { %v775_v62 = vadd.f32 %v774_v13, %v773_v56  ;;  %v770_v28 = vadd.f32 %v769_v8, %v768_v7 }
 0x43d   :  { %v780_v60 = vsel %vm95_vm1, %v748_v10, 0.0  ;;  %v765_v37 = vadd.f32 %v764_v63, %v763_v25 }
 0x43e   :  { %v781_v2 = vrot.slane %v780_v60, 4  ;;  %v732_v3 = vpop.permute.xlu0 %731  ;;  %v776_v18 = vrot.slane %v775_v62, 2  ;;  %v771_v1 = vrot.slane %v770_v28, 1 }
 0x43f   :  { %v749_v4 = vmul.f32 %v732_v3, %v1185_v14 }
 0x440   :  { %v782_v5 = vadd.f32 %v781_v2, %v780_v60  ;;  %v777_v31 = vadd.f32 %v776_v18, %v775_v62  ;;  %v772_v44 = vadd.f32 %v771_v1, %v770_v28 }
 0x441   :  { %v787_v9 = vsel %vm95_vm1, %v749_v4, 0.0 }
 0x442   :  { %v788_v20 = vrot.slane %v787_v9, 4  ;;  %v737_v22 = vpop.permute.xlu0 %736  ;;  %v783_v12 = vrot.slane %v782_v5, 2  ;;  %v778_v6 = vrot.slane %v777_v31, 1 }
 0x443   :  { %v750_v24 = vmul.f32 %v737_v22, %v1189_v15  ;;  %v757_v15 = vrot.slane %v756_v39, 1 }
 0x444   :  { %v789_v26 = vadd.f32 %v788_v20, %v787_v9  ;;  %v784_v35 = vadd.f32 %v783_v12, %v782_v5  ;;  %v779_v32 = vadd.f32 %v778_v6, %v777_v31 }
 0x445   :  { %v794_v29 = vsel %vm95_vm1, %v750_v24, 0.0  ;;  %v758_v21 = vadd.f32 %v757_v15, %v756_v39 }
 0x446   :  { %v790_v14 = vrot.slane %v789_v26, 2  ;;  %v795_v33 = vrot.slane %v794_v29, 4  ;;  %v742_v34 = vpop.permute.xlu0 %741  ;;  %v785_v23 = vrot.slane %v784_v35, 1 }
 0x447   :  { %v751_v30 = vmul.f32 %v742_v34, %v1195_v16  ;;  %v816_v50 = vsel %vm488_vm3, %v765_v37, %v758_v21 }
 0x448   :  { %v791_v38 = vadd.f32 %v790_v14, %v789_v26  ;;  %v796_v0 = vadd.f32 %v795_v33, %v794_v29  ;;  %v786_v46 = vadd.f32 %v785_v23, %v784_v35  ;;  %v817_v47 = vsel %vm490_vm4, %v772_v44, %v816_v50 }
 0x449   :  { %v801_v40 = vsel %vm95_vm1, %v751_v30, 0.0  ;;  %v818_v53 = vsel %vm492_vm5, %v779_v32, %v817_v47 }
 0x44a   :  { %v797_v36 = vrot.slane %v796_v0, 2  ;;  %v802_v41 = vrot.slane %v801_v40, 4  ;;  %v792_v43 = vrot.slane %v791_v38, 1  ;;  %v819_v54 = vsel %vm494_vm6, %v786_v46, %v818_v53 }
 0x44c   :  { %v798_v27 = vadd.f32 %v797_v36, %v796_v0  ;;  %v803_v42 = vadd.f32 %v802_v41, %v801_v40  ;;  %v793_v19 = vadd.f32 %v792_v43, %v791_v38 }
 0x44e   :  { %v799_v45 = vrot.slane %v798_v27, 1  ;;  %v804_v16 = vrot.slane %v803_v42, 2  ;;  %v820_v55 = vsel %vm496_vm7, %v793_v19, %v819_v54 }
 0x450   :  { %v805_v51 = vadd.f32 %v804_v16, %v803_v42  ;;  %v800_v52 = vadd.f32 %v799_v45, %v798_v27 }
 0x452   :  { %v806_v48 = vrot.slane %v805_v51, 1  ;;  %v821_v56 = vsel %vm498_vm8, %v800_v52, %v820_v55 }
 0x454   :  { %v807_v49 = vadd.f32 %v806_v48, %v805_v51 }
 0x456   :  { %v822_v57 = vsel %vm500_vm9, %v807_v49, %v821_v56 }
 0x457   :  { %824 = vst.msk [vmem:[#allocation10] sm:$0xff] %vm95_vm1, %v822_v57 }
 0x458   :  { %1043 = shalt.err (!%p1040_p8)
}
 0x459   :  { %s1044_s25 = scalar_lea.hbm %s1371_s6, 128 }
 0x45a   :  { %p1045_p9 = scmp.ne.s32.totalorder %s1371_s6, %s1044_s25  ;;  %p1048_p10 = scmp.lt.u32.totalorder %s1044_s25, %s1371_s6 }
 0x45c   :  { %p1050_p11 = pnand %p1048_p10, %p1045_p9 }
 0x45e   :  { %1053 = shalt.err (!%p1050_p11)
}
 0x45f   :  { %834 = dma.vmem_to_hbm [thread:$0]  %s832_s1, 128, %s1371_s6, [#allocation4]  }
 0x460   :  { %1060 = dma.done.wait [#allocation4], 128  }
 0x461   :  { %1061 = vsyncadd [#allocation4], 4294967168 }
 0x462   :  { %838 = vsyncpa [#allocation3], 1 }
 0x463   :  { %839 = vsyncpa [#allocation6], 1 }
 0x464   :  { %840 = vsyncpa [#allocation9], 1 }
 0x465   :  { %841 = vsyncpa [#allocation4], 1 }

</bundles_post_ra>
